<compile_context>
chip_gen: v7x
topology: tpu7x:2x2x1
jax: 0.10.0
libtpu: 0.0.40
codegen_flags: <defaults>
</compile_context>

<pallas_src>
import jax
import jax.numpy as jnp
from jax.experimental import pallas as pl
from jax.experimental.pallas import tpu as pltpu

K_IN = 50          # real input features
K_PAD = 128        # lane-padded contraction dim for the first matmul
H = 256            # hidden width
N_OUT = 10         # real output features (last block dim == full dim -> legal, no lane padding)
BN_EPS = 1e-5

_RESIDENT_H2_BYTES = 16 << 20   # keep h2 resident in VMEM while it needs <= 16 MiB (safe on v7x)


def _round_up(n, m):
    return (n + m - 1) // m * m


# --------------------------------------------------------------------------------------------
# One-time parameter preparation (hoisted out of the per-call forward).
# --------------------------------------------------------------------------------------------
def prepare_params(params, compute_dtype=jnp.float32):
    """Pad / cast / reshape weights once. Weights stored (in, out). Biases/BN params stay f32."""
    cdt = jnp.dtype(compute_dtype)
    f32 = jnp.float32
    w1 = jnp.zeros((K_PAD, H), cdt).at[:K_IN, :].set(params["w1"].astype(cdt))
    w2 = params["w2"].astype(cdt)
    w3 = params["w3"].astype(cdt)                       # (H, 10): last dim == full dim, legal
    return {
        "w1": w1,
        "b1": params["b1"].astype(f32).reshape(1, H),
        "w2": w2,
        "b2": params["b2"].astype(f32).reshape(1, H),
        "gamma": params["gamma"].astype(f32).reshape(1, H),
        "beta": params["beta"].astype(f32).reshape(1, H),
        "w3": w3,
        "b3": params["b3"].astype(f32).reshape(1, N_OUT),
    }


# --------------------------------------------------------------------------------------------
# Fused forward
# --------------------------------------------------------------------------------------------
def mlp_v3_forward(x, prep, *, max_resident_h2_bytes=_RESIDENT_H2_BYTES):
    """x: (B, 50) float32.  prep: output of prepare_params().  Returns (B, 10) f32."""
    B, k = x.shape
    assert k == K_IN and B > 1
    f32 = jnp.float32
    cdt = jnp.dtype(prep["w1"].dtype)
    itemsize = cdt.itemsize

    # ---- batch tiling: big tiles amortize per-step overhead; small B -> single tile ----
    b8 = _round_up(B, 8)
    if b8 >= 512:
        tile_b = 512                      # multiple of 256 -> clean MXU cadence on v6e/v7x
        b_pad = _round_up(B, tile_b)
    else:
        tile_b = b8
        b_pad = b8
    n_tiles = b_pad // tile_b
    inv_b = 1.0 / B

    # resident-h2 variant only while the scratch fits the VMEM budget (v7x: 64 MiB physical)
    resident = (b_pad * H * 4) <= max_resident_h2_bytes

    # ---- per-call activation padding only (lane-dense K) ----
    xp = jnp.zeros((b_pad, K_PAD), cdt).at[:B, :K_IN].set(x.astype(cdt))

    # ---------------------------------- kernel ----------------------------------
    def kernel(x_ref, w1_ref, b1_ref, w2_ref, b2_ref, gamma_ref, beta_ref, w3_ref, b3_ref,
               o_ref, sum_ref, ssq_ref, *h2_scratch):
        phase = pl.program_id(0)
        i = pl.program_id(1)

        def compute_h2():
            # Linear(50->256, K lane-padded) + ReLU; f32 MXU accumulation
            h1 = jnp.dot(x_ref[...], w1_ref[...],
                         preferred_element_type=jnp.float32) + b1_ref[...]
            h1 = jnp.maximum(h1, 0.0)
            # Linear(256->256); keep h2 f32 for exact BN statistics
            return jnp.dot(h1.astype(w2_ref.dtype), w2_ref[...],
                           preferred_element_type=jnp.float32) + b2_ref[...]

        # ---------------- phase 0: h2 + single-pass batch statistics ----------------
        @pl.when(phase == 0)
        def _():
            @pl.when(i == 0)
            def _():
                sum_ref[...] = jnp.zeros_like(sum_ref)
                ssq_ref[...] = jnp.zeros_like(ssq_ref)

            h2 = compute_h2()
            if resident:
                off = pl.multiple_of(i * tile_b, 8)
                h2_scratch[0][pl.ds(off, tile_b), :] = h2

            # only the last tile can contain batch-padding rows -> mask only there
            @pl.when(i < n_tiles - 1)
            def _():
                sum_ref[...] += jnp.sum(h2, axis=0, keepdims=True)
                ssq_ref[...] += jnp.sum(h2 * h2, axis=0, keepdims=True)

            @pl.when(i == n_tiles - 1)
            def _():
                row = jax.lax.broadcasted_iota(jnp.int32, h2.shape, 0) + i * tile_b
                h2m = jnp.where(row < B, h2, 0.0)
                sum_ref[...] += jnp.sum(h2m, axis=0, keepdims=True)
                ssq_ref[...] += jnp.sum(h2m * h2m, axis=0, keepdims=True)

        # ---------------- phase 1: BatchNorm + ReLU + Linear3 ----------------
        @pl.when(phase == 1)
        def _():
            mean = sum_ref[...] * inv_b                                    # (1, 256) f32
            var = jnp.maximum(ssq_ref[...] * inv_b - mean * mean, 0.0)     # clamp: NaN guard
            scale = gamma_ref[...] * jax.lax.rsqrt(var + BN_EPS)
            shift = beta_ref[...] - mean * scale
            if resident:
                off = pl.multiple_of(i * tile_b, 8)
                h2 = h2_scratch[0][pl.ds(off, tile_b), :]
            else:
                h2 = compute_h2()                                          # recompute from x
            h3 = jnp.maximum(h2 * scale + shift, 0.0)
            y = jnp.dot(h3.astype(w3_ref.dtype), w3_ref[...],
                        preferred_element_type=jnp.float32) + b3_ref[...]
            o_ref[...] = y.astype(o_ref.dtype)

    # ---------------------------------- specs ----------------------------------
    const = lambda p, i: (0, 0)                 # weights / biases: VMEM-resident across the grid
    if resident:
        x_map = lambda p, i: (i * (1 - p), 0)   # x only streamed in phase 0
    else:
        x_map = lambda p, i: (i, 0)             # x streamed in both phases (recompute)
    out_map = lambda p, i: (i * p, 0)           # output blocks only advance in phase 1

    in_specs = [
        pl.BlockSpec((tile_b, K_PAD), x_map),   # x tile (pipelined)
        pl.BlockSpec((K_PAD, H), const),        # w1
        pl.BlockSpec((1, H), const),            # b1
        pl.BlockSpec((H, H), const),            # w2
        pl.BlockSpec((1, H), const),            # b2
        pl.BlockSpec((1, H), const),            # gamma
        pl.BlockSpec((1, H), const),            # beta
        pl.BlockSpec((H, N_OUT), const),        # w3 (no lane padding: last dim == full dim)
        pl.BlockSpec((1, N_OUT), const),        # b3
    ]
    scratch = [pltpu.VMEM((1, H), f32), pltpu.VMEM((1, H), f32)]      # sum / sum-of-squares
    if resident:
        scratch.append(pltpu.VMEM((b_pad, H), f32))                   # resident h2

    # explicit VMEM budget (double-buffered tiles + resident weights + scratch + margin)
    vmem_need = (2 * tile_b * K_PAD * itemsize
                 + 2 * tile_b * N_OUT * 4
                 + 2 * (K_PAD * H + H * H + H * N_OUT) * itemsize
                 + 2 * 8 * (5 * H + N_OUT) * 4
                 + 2 * 8 * H * 4
                 + (b_pad * H * 4 if resident else 0))
    vmem_limit = int(min(vmem_need + (4 << 20), 40 << 20))

    recompute_factor = 1 if resident else 2
    cost = pl.CostEstimate(
        flops=2 * b_pad * (K_PAD * H + H * H) * recompute_factor
              + 2 * b_pad * H * N_OUT + 10 * b_pad * H,
        transcendentals=n_tiles * H,
        bytes_accessed=(b_pad * K_PAD * itemsize * (1 if resident else 2)
                        + (K_PAD * H + H * H + H * N_OUT) * itemsize
                        + b_pad * N_OUT * 4 + 7 * H * 4),
    )

    out_pad = pl.pallas_call(
        kernel,
        grid=(2, n_tiles),
        in_specs=in_specs,
        out_specs=pl.BlockSpec((tile_b, N_OUT), out_map),
        out_shape=jax.ShapeDtypeStruct((b_pad, N_OUT), f32),
        scratch_shapes=scratch,
        compiler_params=pltpu.CompilerParams(
            dimension_semantics=("arbitrary", "arbitrary"),
            vmem_limit_bytes=vmem_limit),
        cost_estimate=cost,
    )(xp, prep["w1"], prep["b1"], prep["w2"], prep["b2"],
      prep["gamma"], prep["beta"], prep["w3"], prep["b3"])

    return out_pad[:B]   # drop batch padding rows; output is already exactly 10 wide


# --------------------------------------------------------------------------------------------
# Synthetic parameters & pure-JAX reference
# --------------------------------------------------------------------------------------------
def init_params(key):
    """Deterministic synthetic init (PyTorch-Linear-style uniform bounds), (in, out) layout."""
    ks = jax.random.split(key, 6)

    def linear(kw, kb, fan_in, fan_out):
        bound = 1.0 / jnp.sqrt(fan_in)
        w = jax.random.uniform(kw, (fan_in, fan_out), jnp.float32, -bound, bound)
        b = jax.random.uniform(kb, (fan_out,), jnp.float32, -bound, bound)
        return w, b

    w1, b1 = linear(ks[0], ks[1], 50, 256)
    w2, b2 = linear(ks[2], ks[3], 256, 256)
    w3, b3 = linear(ks[4], ks[5], 256, 10)
    gamma = jnp.ones((256,), jnp.float32)    # BatchNorm1d default affine init
    beta = jnp.zeros((256,), jnp.float32)
    return {"w1": w1, "b1": b1, "w2": w2, "b2": b2,
            "gamma": gamma, "beta": beta, "w3": w3, "b3": b3}


def reference_forward(x, params):
    """Pure-JAX reference with identical (PyTorch training-mode) semantics."""
    h1 = jnp.maximum(x @ params["w1"] + params["b1"], 0.0)
    h2 = h1 @ params["w2"] + params["b2"]
    mean = jnp.mean(h2, axis=0, keepdims=True)
    var = jnp.mean((h2 - mean) ** 2, axis=0, keepdims=True)
    h2n = (h2 - mean) / jnp.sqrt(var + BN_EPS) * params["gamma"] + params["beta"]
    h3 = jnp.maximum(h2n, 0.0)
    return h3 @ params["w3"] + params["b3"]


if __name__ == "__main__":
    key = jax.random.PRNGKey(0)
    k_x, k_p, k_x2 = jax.random.split(key, 3)
    params = init_params(k_p)
    prep_f32 = prepare_params(params, jnp.float32)
    prep_bf16 = prepare_params(params, jnp.bfloat16)

    # small batch (training-mode BatchNorm needs B > 1): single tile, resident-h2 path
    B = 8
    x = jax.random.normal(k_x, (B, 50), jnp.float32)
    out = jax.block_until_ready(mlp_v3_forward(x, prep_f32))
    ref = reference_forward(x, params)
    assert out.shape == (B, 10)
    assert jnp.allclose(out, ref, atol=1e-4, rtol=1e-3), "mismatch vs reference (B=8)"

    # larger batch: multi-tile grid + masked last-tile stats, resident-h2 path
    B2 = 600
    x2 = jax.random.normal(k_x2, (B2, 50), jnp.float32)
    out2 = jax.block_until_ready(mlp_v3_forward(x2, prep_f32))
    ref2 = reference_forward(x2, params)
    assert out2.shape == (B2, 10)
    assert jnp.allclose(out2, ref2, atol=2e-4, rtol=2e-3), "mismatch vs reference (B=600)"

    # force the large-batch recompute path (no h2 materialized anywhere)
    out2r = jax.block_until_ready(
        mlp_v3_forward(x2, prep_f32, max_resident_h2_bytes=0))
    assert jnp.allclose(out2r, ref2, atol=2e-4, rtol=2e-3), "mismatch vs reference (recompute)"

    # bf16 matmul-input path (all generations): f32 accumulation + f32 BN stats,
    # explicit tolerance against the f32 reference
    out_bf16 = jax.block_until_ready(mlp_v3_forward(x, prep_bf16))
    assert out_bf16.shape == (B, 10)
    assert bool(jnp.isfinite(out_bf16).all())
    rel_err = jnp.max(jnp.abs(out_bf16 - ref)) / (jnp.max(jnp.abs(ref)) + 1e-6)
    assert float(rel_err) < 0.2, f"bf16 path error too large: {float(rel_err)}"

    print("KERNEL_OK")
</pallas_src>

<mosaic_0001>
module attributes {stable_mosaic.version = 11 : i64} {
  func.func @kernel(%arg0: i32, %arg1: i32, %arg2: memref<8x128xf32, #tpu.memory_space<vmem>>, %arg3: memref<128x256xf32, #tpu.memory_space<vmem>>, %arg4: memref<1x256xf32, #tpu.memory_space<vmem>>, %arg5: memref<256x256xf32, #tpu.memory_space<vmem>>, %arg6: memref<1x256xf32, #tpu.memory_space<vmem>>, %arg7: memref<1x256xf32, #tpu.memory_space<vmem>>, %arg8: memref<1x256xf32, #tpu.memory_space<vmem>>, %arg9: memref<256x10xf32, #tpu.memory_space<vmem>>, %arg10: memref<1x10xf32, #tpu.memory_space<vmem>>, %arg11: memref<8x10xf32, #tpu.memory_space<vmem>>, %arg12: memref<1x256xf32, #tpu.memory_space<vmem>>, %arg13: memref<1x256xf32, #tpu.memory_space<vmem>>, %arg14: memref<8x256xf32, #tpu.memory_space<vmem>>) attributes {dimension_semantics = [#tpu.dimension_semantics<arbitrary>, #tpu.dimension_semantics<arbitrary>], iteration_bounds = array<i64: 2, 1>, scalar_prefetch = 0 : i64, scratch_operands = 3 : i64, tpu.core_type = #tpu.core_type<tc>, window_params = [{transform_indices = @transform_0, window_bounds = array<i64: 8, 128>}, {pipeline_mode = #tpu.pipeline_mode<synchronous>, transform_indices = @transform_1, window_bounds = array<i64: 128, 256>}, {pipeline_mode = #tpu.pipeline_mode<synchronous>, transform_indices = @transform_2, window_bounds = array<i64: 1, 256>}, {pipeline_mode = #tpu.pipeline_mode<synchronous>, transform_indices = @transform_3, window_bounds = array<i64: 256, 256>}, {pipeline_mode = #tpu.pipeline_mode<synchronous>, transform_indices = @transform_4, window_bounds = array<i64: 1, 256>}, {pipeline_mode = #tpu.pipeline_mode<synchronous>, transform_indices = @transform_5, window_bounds = array<i64: 1, 256>}, {pipeline_mode = #tpu.pipeline_mode<synchronous>, transform_indices = @transform_6, window_bounds = array<i64: 1, 256>}, {pipeline_mode = #tpu.pipeline_mode<synchronous>, transform_indices = @transform_7, window_bounds = array<i64: 256, 10>}, {pipeline_mode = #tpu.pipeline_mode<synchronous>, transform_indices = @transform_8, window_bounds = array<i64: 1, 10>}, {transform_indices = @transform_9, window_bounds = array<i64: 8, 10>}]} {
    %c0_i32 = arith.constant 0 : i32
    %0 = arith.cmpi eq, %arg0, %c0_i32 : i32
    %1 = arith.extui %0 : i1 to i32
    %c0_i32_0 = arith.constant 0 : i32
    %2 = arith.cmpi ne, %1, %c0_i32_0 : i32
    scf.if %2 {
      %c0_i32_2 = arith.constant 0 : i32
      %6 = arith.cmpi eq, %arg1, %c0_i32_2 : i32
      %7 = arith.extui %6 : i1 to i32
      %c0_i32_3 = arith.constant 0 : i32
      %8 = arith.cmpi ne, %7, %c0_i32_3 : i32
      scf.if %8 {
        %cst_20 = arith.constant 0.000000e+00 : f32
        %32 = vector.broadcast %cst_20 : f32 to vector<1x256xf32>
        %c0_21 = arith.constant 0 : index
        %c0_22 = arith.constant 0 : index
        %33 = vector.load %arg12[%c0_21, %c0_22] : memref<1x256xf32, #tpu.memory_space<vmem>>, vector<1x256xf32>
        tpu.vector_store %arg12[%c0_21, %c0_22], %32 {strides = array<i32>} : memref<1x256xf32, #tpu.memory_space<vmem>>, vector<1x256xf32>,
        %cst_23 = arith.constant 0.000000e+00 : f32
        %34 = vector.broadcast %cst_23 : f32 to vector<1x256xf32>
        %c0_24 = arith.constant 0 : index
        %c0_25 = arith.constant 0 : index
        %35 = vector.load %arg13[%c0_24, %c0_25] : memref<1x256xf32, #tpu.memory_space<vmem>>, vector<1x256xf32>
        tpu.vector_store %arg13[%c0_24, %c0_25], %34 {strides = array<i32>} : memref<1x256xf32, #tpu.memory_space<vmem>>, vector<1x256xf32>,
      } else {
      }
      %c0 = arith.constant 0 : index
      %c0_4 = arith.constant 0 : index
      %9 = vector.load %arg2[%c0, %c0_4] : memref<8x128xf32, #tpu.memory_space<vmem>>, vector<8x128xf32>
      %c0_5 = arith.constant 0 : index
      %c0_6 = arith.constant 0 : index
      %10 = vector.load %arg3[%c0_5, %c0_6] : memref<128x256xf32, #tpu.memory_space<vmem>>, vector<128x256xf32>
      %cst = arith.constant dense<0.000000e+00> : vector<8x256xf32>
      %11 = tpu.matmul %9, %10, %cst {dimension_numbers = #tpu.dot_dimension_numbers<[1], [0], [0], [1], [0, 0, 1, 1], [], []>} : vector<8x128xf32>, vector<128x256xf32>, vector<8x256xf32> -> vector<8x256xf32>
      %c0_7 = arith.constant 0 : index
      %c0_8 = arith.constant 0 : index
      %12 = vector.load %arg4[%c0_7, %c0_8] : memref<1x256xf32, #tpu.memory_space<vmem>>, vector<1x256xf32>
      %13 = vector.broadcast %12 : vector<1x256xf32> to vector<8x256xf32>
      %14 = arith.addf %11, %13 : vector<8x256xf32>
      %cst_9 = arith.constant 0.000000e+00 : f32
      %15 = vector.broadcast %cst_9 : f32 to vector<8x256xf32>
      %16 = arith.maximumf %14, %15 : vector<8x256xf32>
      %c0_10 = arith.constant 0 : index
      %c0_11 = arith.constant 0 : index
      %17 = vector.load %arg5[%c0_10, %c0_11] : memref<256x256xf32, #tpu.memory_space<vmem>>, vector<256x256xf32>
      %cst_12 = arith.constant dense<0.000000e+00> : vector<8x256xf32>
      %18 = tpu.matmul %16, %17, %cst_12 {dimension_numbers = #tpu.dot_dimension_numbers<[1], [0], [0], [1], [0, 0, 1, 1], [], []>} : vector<8x256xf32>, vector<256x256xf32>, vector<8x256xf32> -> vector<8x256xf32>
      %c0_13 = arith.constant 0 : index
      %c0_14 = arith.constant 0 : index
      %19 = vector.load %arg6[%c0_13, %c0_14] : memref<1x256xf32, #tpu.memory_space<vmem>>, vector<1x256xf32>
      %20 = vector.broadcast %19 : vector<1x256xf32> to vector<8x256xf32>
      %21 = arith.addf %18, %20 : vector<8x256xf32>
      %c8_i32 = arith.constant 8 : i32
      %22 = arith.muli %arg1, %c8_i32 : i32
      %23 = tpu.assume_multiple %22, 8 : i32
      %24 = arith.index_cast %23 : i32 to index
      %c0_15 = arith.constant 0 : index
      %25 = vector.load %arg14[%24, %c0_15] : memref<8x256xf32, #tpu.memory_space<vmem>>, vector<8x256xf32>
      tpu.vector_store %arg14[%24, %c0_15], %21 {strides = array<i32>} : memref<8x256xf32, #tpu.memory_space<vmem>>, vector<8x256xf32>,
      %c0_i32_16 = arith.constant 0 : i32
      %26 = arith.cmpi slt, %arg1, %c0_i32_16 : i32
      %27 = arith.extui %26 : i1 to i32
      %c0_i32_17 = arith.constant 0 : i32
      %28 = arith.cmpi ne, %27, %c0_i32_17 : i32
      scf.if %28 {
        %c0_20 = arith.constant 0 : index
        %c0_21 = arith.constant 0 : index
        %32 = vector.load %arg12[%c0_20, %c0_21] : memref<1x256xf32, #tpu.memory_space<vmem>>, vector<1x256xf32>
        %cst_22 = arith.constant dense<0.000000e+00> : vector<256xf32>
        %33 = vector.multi_reduction <add>, %21, %cst_22 [0] : vector<8x256xf32> to vector<256xf32>
        %34 = vector.shape_cast %33 : vector<256xf32> to vector<1x256xf32>
        %35 = arith.addf %32, %34 : vector<1x256xf32>
        %c0_23 = arith.constant 0 : index
        %c0_24 = arith.constant 0 : index
        %36 = vector.load %arg12[%c0_23, %c0_24] : memref<1x256xf32, #tpu.memory_space<vmem>>, vector<1x256xf32>
        tpu.vector_store %arg12[%c0_23, %c0_24], %35 {strides = array<i32>} : memref<1x256xf32, #tpu.memory_space<vmem>>, vector<1x256xf32>,
        %c0_25 = arith.constant 0 : index
        %c0_26 = arith.constant 0 : index
        %37 = vector.load %arg13[%c0_25, %c0_26] : memref<1x256xf32, #tpu.memory_space<vmem>>, vector<1x256xf32>
        %38 = arith.mulf %21, %21 : vector<8x256xf32>
        %cst_27 = arith.constant dense<0.000000e+00> : vector<256xf32>
        %39 = vector.multi_reduction <add>, %38, %cst_27 [0] : vector<8x256xf32> to vector<256xf32>
        %40 = vector.shape_cast %39 : vector<256xf32> to vector<1x256xf32>
        %41 = arith.addf %37, %40 : vector<1x256xf32>
        %c0_28 = arith.constant 0 : index
        %c0_29 = arith.constant 0 : index
        %42 = vector.load %arg13[%c0_28, %c0_29] : memref<1x256xf32, #tpu.memory_space<vmem>>, vector<1x256xf32>
        tpu.vector_store %arg13[%c0_28, %c0_29], %41 {strides = array<i32>} : memref<1x256xf32, #tpu.memory_space<vmem>>, vector<1x256xf32>,
      } else {
      }
      %c0_i32_18 = arith.constant 0 : i32
      %29 = arith.cmpi eq, %arg1, %c0_i32_18 : i32
      %30 = arith.extui %29 : i1 to i32
      %c0_i32_19 = arith.constant 0 : i32
      %31 = arith.cmpi ne, %30, %c0_i32_19 : i32
      scf.if %31 {
        %32 = tpu.iota {dimensions = array<i32: 0>} : vector<8x256xi32>
        %c8_i32_20 = arith.constant 8 : i32
        %33 = arith.muli %arg1, %c8_i32_20 : i32
        %34 = vector.broadcast %33 : i32 to vector<8x256xi32>
        %35 = arith.addi %32, %34 : vector<8x256xi32>
        %c8_i32_21 = arith.constant 8 : i32
        %36 = vector.broadcast %c8_i32_21 : i32 to vector<8x256xi32>
        %37 = arith.cmpi slt, %35, %36 : vector<8x256xi32>
        %cst_22 = arith.constant 0.000000e+00 : f32
        %38 = vector.broadcast %cst_22 : f32 to vector<8x256xf32>
        %39 = arith.select %37, %21, %38 : vector<8x256xi1>, vector<8x256xf32>
        %c0_23 = arith.constant 0 : index
        %c0_24 = arith.constant 0 : index
        %40 = vector.load %arg12[%c0_23, %c0_24] : memref<1x256xf32, #tpu.memory_space<vmem>>, vector<1x256xf32>
        %cst_25 = arith.constant dense<0.000000e+00> : vector<256xf32>
        %41 = vector.multi_reduction <add>, %39, %cst_25 [0] : vector<8x256xf32> to vector<256xf32>
        %42 = vector.shape_cast %41 : vector<256xf32> to vector<1x256xf32>
        %43 = arith.addf %40, %42 : vector<1x256xf32>
        %c0_26 = arith.constant 0 : index
        %c0_27 = arith.constant 0 : index
        %44 = vector.load %arg12[%c0_26, %c0_27] : memref<1x256xf32, #tpu.memory_space<vmem>>, vector<1x256xf32>
        tpu.vector_store %arg12[%c0_26, %c0_27], %43 {strides = array<i32>} : memref<1x256xf32, #tpu.memory_space<vmem>>, vector<1x256xf32>,
        %c0_28 = arith.constant 0 : index
        %c0_29 = arith.constant 0 : index
        %45 = vector.load %arg13[%c0_28, %c0_29] : memref<1x256xf32, #tpu.memory_space<vmem>>, vector<1x256xf32>
        %46 = arith.mulf %39, %39 : vector<8x256xf32>
        %cst_30 = arith.constant dense<0.000000e+00> : vector<256xf32>
        %47 = vector.multi_reduction <add>, %46, %cst_30 [0] : vector<8x256xf32> to vector<256xf32>
        %48 = vector.shape_cast %47 : vector<256xf32> to vector<1x256xf32>
        %49 = arith.addf %45, %48 : vector<1x256xf32>
        %c0_31 = arith.constant 0 : index
        %c0_32 = arith.constant 0 : index
        %50 = vector.load %arg13[%c0_31, %c0_32] : memref<1x256xf32, #tpu.memory_space<vmem>>, vector<1x256xf32>
        tpu.vector_store %arg13[%c0_31, %c0_32], %49 {strides = array<i32>} : memref<1x256xf32, #tpu.memory_space<vmem>>, vector<1x256xf32>,
      } else {
      }
    } else {
    }
    %c1_i32 = arith.constant 1 : i32
    %3 = arith.cmpi eq, %arg0, %c1_i32 : i32
    %4 = arith.extui %3 : i1 to i32
    %c0_i32_1 = arith.constant 0 : i32
    %5 = arith.cmpi ne, %4, %c0_i32_1 : i32
    scf.if %5 {
      %c0 = arith.constant 0 : index
      %c0_2 = arith.constant 0 : index
      %6 = vector.load %arg12[%c0, %c0_2] : memref<1x256xf32, #tpu.memory_space<vmem>>, vector<1x256xf32>
      %cst = arith.constant 1.250000e-01 : f32
      %7 = vector.broadcast %cst : f32 to vector<1x256xf32>
      %8 = arith.mulf %6, %7 : vector<1x256xf32>
      %c0_3 = arith.constant 0 : index
      %c0_4 = arith.constant 0 : index
      %9 = vector.load %arg13[%c0_3, %c0_4] : memref<1x256xf32, #tpu.memory_space<vmem>>, vector<1x256xf32>
      %cst_5 = arith.constant 1.250000e-01 : f32
      %10 = vector.broadcast %cst_5 : f32 to vector<1x256xf32>
      %11 = arith.mulf %9, %10 : vector<1x256xf32>
      %12 = arith.mulf %8, %8 : vector<1x256xf32>
      %13 = arith.subf %11, %12 : vector<1x256xf32>
      %cst_6 = arith.constant 0.000000e+00 : f32
      %14 = vector.broadcast %cst_6 : f32 to vector<1x256xf32>
      %15 = arith.maximumf %13, %14 : vector<1x256xf32>
      %c0_7 = arith.constant 0 : index
      %c0_8 = arith.constant 0 : index
      %16 = vector.load %arg7[%c0_7, %c0_8] : memref<1x256xf32, #tpu.memory_space<vmem>>, vector<1x256xf32>
      %cst_9 = arith.constant 9.99999974E-6 : f32
      %17 = vector.broadcast %cst_9 : f32 to vector<1x256xf32>
      %18 = arith.addf %15, %17 : vector<1x256xf32>
      %19 = math.rsqrt %18 : vector<1x256xf32>
      %20 = arith.mulf %16, %19 : vector<1x256xf32>
      %c0_10 = arith.constant 0 : index
      %c0_11 = arith.constant 0 : index
      %21 = vector.load %arg8[%c0_10, %c0_11] : memref<1x256xf32, #tpu.memory_space<vmem>>, vector<1x256xf32>
      %22 = arith.mulf %8, %20 : vector<1x256xf32>
      %23 = arith.subf %21, %22 : vector<1x256xf32>
      %c8_i32 = arith.constant 8 : i32
      %24 = arith.muli %arg1, %c8_i32 : i32
      %25 = tpu.assume_multiple %24, 8 : i32
      %26 = arith.index_cast %25 : i32 to index
      %c0_12 = arith.constant 0 : index
      %27 = vector.load %arg14[%26, %c0_12] : memref<8x256xf32, #tpu.memory_space<vmem>>, vector<8x256xf32>
      %28 = vector.broadcast %20 : vector<1x256xf32> to vector<8x256xf32>
      %29 = arith.mulf %27, %28 : vector<8x256xf32>
      %30 = vector.broadcast %23 : vector<1x256xf32> to vector<8x256xf32>
      %31 = arith.addf %29, %30 : vector<8x256xf32>
      %cst_13 = arith.constant 0.000000e+00 : f32
      %32 = vector.broadcast %cst_13 : f32 to vector<8x256xf32>
      %33 = arith.maximumf %31, %32 : vector<8x256xf32>
      %c0_14 = arith.constant 0 : index
      %c0_15 = arith.constant 0 : index
      %34 = vector.load %arg9[%c0_14, %c0_15] : memref<256x10xf32, #tpu.memory_space<vmem>>, vector<256x10xf32>
      %cst_16 = arith.constant dense<0.000000e+00> : vector<8x10xf32>
      %35 = tpu.matmul %33, %34, %cst_16 {dimension_numbers = #tpu.dot_dimension_numbers<[1], [0], [0], [1], [0, 0, 1, 1], [], []>} : vector<8x256xf32>, vector<256x10xf32>, vector<8x10xf32> -> vector<8x10xf32>
      %c0_17 = arith.constant 0 : index
      %c0_18 = arith.constant 0 : index
      %36 = vector.load %arg10[%c0_17, %c0_18] : memref<1x10xf32, #tpu.memory_space<vmem>>, vector<1x10xf32>
      %37 = vector.broadcast %36 : vector<1x10xf32> to vector<8x10xf32>
      %38 = arith.addf %35, %37 : vector<8x10xf32>
      %c0_19 = arith.constant 0 : index
      %c0_20 = arith.constant 0 : index
      %39 = vector.load %arg11[%c0_19, %c0_20] : memref<8x10xf32, #tpu.memory_space<vmem>>, vector<8x10xf32>
      tpu.vector_store %arg11[%c0_19, %c0_20], %38 {strides = array<i32>} : memref<8x10xf32, #tpu.memory_space<vmem>>, vector<8x10xf32>,
    } else {
    }
    return
  }
  func.func @transform_0(%arg0: i32, %arg1: i32) -> (i32, i32) {
    %c1_i32 = arith.constant 1 : i32
    %0 = arith.subi %c1_i32, %arg0 : i32
    %1 = arith.muli %arg1, %0 : i32
    %c0_i32 = arith.constant 0 : i32
    %c0_i32_0 = arith.constant 0 : i32
    return %1, %c0_i32 : i32, i32
  }
  func.func @transform_1(%arg0: i32, %arg1: i32) -> (i32, i32) {
    %c0_i32 = arith.constant 0 : i32
    %c0_i32_0 = arith.constant 0 : i32
    %c0_i32_1 = arith.constant 0 : i32
    return %c0_i32, %c0_i32_0 : i32, i32
  }
  func.func @transform_2(%arg0: i32, %arg1: i32) -> (i32, i32) {
    %c0_i32 = arith.constant 0 : i32
    %c0_i32_0 = arith.constant 0 : i32
    %c0_i32_1 = arith.constant 0 : i32
    return %c0_i32, %c0_i32_0 : i32, i32
  }
  func.func @transform_3(%arg0: i32, %arg1: i32) -> (i32, i32) {
    %c0_i32 = arith.constant 0 : i32
    %c0_i32_0 = arith.constant 0 : i32
    %c0_i32_1 = arith.constant 0 : i32
    return %c0_i32, %c0_i32_0 : i32, i32
  }
  func.func @transform_4(%arg0: i32, %arg1: i32) -> (i32, i32) {
    %c0_i32 = arith.constant 0 : i32
    %c0_i32_0 = arith.constant 0 : i32
    %c0_i32_1 = arith.constant 0 : i32
    return %c0_i32, %c0_i32_0 : i32, i32
  }
  func.func @transform_5(%arg0: i32, %arg1: i32) -> (i32, i32) {
    %c0_i32 = arith.constant 0 : i32
    %c0_i32_0 = arith.constant 0 : i32
    %c0_i32_1 = arith.constant 0 : i32
    return %c0_i32, %c0_i32_0 : i32, i32
  }
  func.func @transform_6(%arg0: i32, %arg1: i32) -> (i32, i32) {
    %c0_i32 = arith.constant 0 : i32
    %c0_i32_0 = arith.constant 0 : i32
    %c0_i32_1 = arith.constant 0 : i32
    return %c0_i32, %c0_i32_0 : i32, i32
  }
  func.func @transform_7(%arg0: i32, %arg1: i32) -> (i32, i32) {
    %c0_i32 = arith.constant 0 : i32
    %c0_i32_0 = arith.constant 0 : i32
    %c0_i32_1 = arith.constant 0 : i32
    return %c0_i32, %c0_i32_0 : i32, i32
  }
  func.func @transform_8(%arg0: i32, %arg1: i32) -> (i32, i32) {
    %c0_i32 = arith.constant 0 : i32
    %c0_i32_0 = arith.constant 0 : i32
    %c0_i32_1 = arith.constant 0 : i32
    return %c0_i32, %c0_i32_0 : i32, i32
  }
  func.func @transform_9(%arg0: i32, %arg1: i32) -> (i32, i32) {
    %0 = arith.muli %arg1, %arg0 : i32
    %c0_i32 = arith.constant 0 : i32
    %c0_i32_0 = arith.constant 0 : i32
    return %0, %c0_i32 : i32, i32
  }
}

</mosaic_0001>

<bundles_post_ra>
// kernel: tpu_custom_call.1
= control target key start
LH: loop header
LB: loop body
LE: loop exit
PB: predicated region body
PF: predicated region fallthrough
CT: control target
= control target key end

     0   :  { %14 = vsyncpa [#allocation6], 0  ;;  %s1777_s0 = inlined_call_operand.vmem [shape: f32[8,128], index: 0, kind: input, shape index: {}]   ;;  %s1778_s1 = inlined_call_operand.vmem [shape: f32[128,256], index: 1, kind: input, shape index: {}]   ;;  %s1779_s2 = inlined_call_operand.vmem [shape: f32[1,256], index: 2, kind: input, shape index: {}]   ;;  %s1780_s3 = inlined_call_operand.hbm [shape: f32[256,256], index: 3, kind: input, shape index: {}]   ;;  %s1781_s4 = inlined_call_operand.vmem [shape: f32[1,256], index: 4, kind: input, shape index: {}]   ;;  %s1782_s5 = inlined_call_operand.vmem [shape: f32[1,256], index: 5, kind: input, shape index: {}]   ;;  %s1783_s6 = inlined_call_operand.vmem [shape: f32[1,256], index: 6, kind: input, shape index: {}]   ;;  %s1784_s7 = inlined_call_operand.vmem [shape: f32[256,10], index: 7, kind: input, shape index: {}]   ;;  %s1785_s8 = inlined_call_operand.vmem [shape: f32[1,10], index: 8, kind: input, shape index: {}]   ;;  %s1786_s9 = inlined_call_operand.hbm [shape: f32[8,10], index: 9, kind: output, shape index: {}]  }
   0x1   :  { %15 = vsyncpa [#allocation7], 0 }
   0x2   :  { %17 = vsyncpa [#allocation7 + $0x1], 0  ;;  %s1453_s30 = smov 0   ;;  %s1455_s10 = smov 0  }
   0x3   :  { %s1457_s11 = smov 0  }
   0x4 LB: > { %s1080_s12 = sadd.s32 4294967295, %s1395_s11   ;;  %s1081_s13 = sadd.s32 4294967294, %s1395_s11   ;;  %s1395_s11 = sphi %s1457_s11, %s23_s11   ;;  %s1391_s10 = sphi %s1455_s10, %s1799_s10   ;;  %s1387_s30 = sphi %s1453_s30, %s1798_s30  }
   0x5   : > { %s35_s14 = sadd.s32 1, %s1391_s10  ;;  %p1082_p0 = scmp.ge.s32.totalorder %s1395_s11, 1 }
   0x6   : > { %p37_p1 = scmp.ge.s32.totalorder %s35_s14, 2  ;;  %p266_p2 = scmp.lt.s32.totalorder %s1395_s11, 3 }
   0x7   : > { %p1475_p3 = scmp.eq.s32.totalorder %s1080_s12, 0  ;;  %s1397_s17 = smov [#allocation5]  }
   0x8   : > { %s1801_s14 = smov (%p37_p1, %s35_s14), 0  ;;  %p1481_p4 = pnand %p1082_p0, %p266_p2 }
   0x9   : > { %s1790_s15 = scalar_select %p1475_p3, 1, 0 }
   0xa   : > { %s1791_s16 = scalar_select %p1481_p4, 1, 0 }
   0xb   : > { %s284_s18 = sshll.u32 %s1397_s17, 4  ;;  %p1266_p5 = pneg %p1481_p4  ;;  %s285_s18 = int_to_ptr.vmem [resolvable:$true] %s284_s18 }
   0xc   : > { %s1311_s22 = scalar_lea.hbm %s1780_s3, 8192 }
   0xd   : > { %p1489_p6 = pnand %p1475_p3, %p1266_p5  ;;  %p1312_p7 = scmp.ne.s32.totalorder %s1780_s3, %s1311_s22 }
   0xe   : > { %p1318_p11 = scmp.lt.u32.totalorder %s1311_s22, %s1780_s3 }
   0xf   : > { %p1313_p8 = pneg %p1489_p6 }
  0x11   : > { %p1314_p9 = pnand %p1313_p8, %p1312_p7 }
  0x13   : > { %p1315_p10 = pneg %p1314_p9 }
  0x15   : > { %p1320_p12 = pnand %p1318_p11, %p1315_p10 }
  0x17   : > { %1323 = shalt.err (!%p1320_p12)
}
  0x18   : > { %s1324_s27 = scalar_lea.vmem %s285_s18, 8192  ;;  %p1332_p2 = scmp.lt.s32.totalorder %s285_s18, %s285_s18 }
  0x19   : > { %p1325_p13 = scmp.ne.s32.totalorder %s285_s18, %s1324_s27  ;;  %p1333_p5 = scmp.lt.s32.totalorder %s1324_s27, %s1324_s27 }
  0x1b   : > { %p1327_p0 = pnand %p1325_p13, %p1313_p8  ;;  %p1334_p3 = por %p1333_p5, %p1332_p2 }
  0x1d   : > { %p1328_p1 = pneg %p1327_p0 }
  0x1f   : > { %p1335_p4 = pnand %p1334_p3, %p1328_p1 }
  0x21   : > { %1338 = shalt.err (!%p1335_p4)
}
  0x22   : > { %s1398_s28 = smov 256   ;;  %s1399_s29 = smov 16  }
  0x23   : > { %1269 = dma.hbm_to_vmem [thread:$0]  (!%p1489_p6), %s1780_s3, 8192, %s285_s18, [#allocation6], %s1398_s28, %s1398_s28, %s1399_s29  }
  0x24   : > { %p1793_p7 = scmp.ne.s32.totalorder %s1791_s16, 0 }
  0x25   : > { %p1794_p9 = scmp.ne.s32.totalorder (!%p1793_p7), %s1790_s15, 0 }
  0x26   : > { %326 = sbr.rel (%p1793_p7) target bundleno = 821 (0x335), region = 56 }
  0x2d   : > { %1378 = dma.done.wait (%p1794_p9), [#allocation6], 8192  }
  0x2e   : > { %1380 = vsyncadd (%p1794_p9), [#allocation6], 4294959104  ;;  %p1088_p3 = scmp.ne.s32.totalorder %s1387_s30, 0 }
  0x2f   : > { %v388_v0 = vld [vmem:[%s1778_s1 + $0x8] sm:$0xff] (!%p1088_p3)  ;;  %v390_v1 = vld [vmem:[%s1778_s1 + $0x18] sm:$0xff] (!%p1088_p3)  ;;  %v387_v2 = vld [vmem:[%s1778_s1] sm:$0xff] (!%p1088_p3)  ;;  %v380_v3 = vlaneseq (!%p1088_p3)  ;;  %v1400_v8 = vmov (!%p1088_p3), 0.0  }
  0x30   : > { %375 = sbr.rel (%p1088_p3) target bundleno = 538 (0x21a), region = 64  ;;  %v1130_v4 = vpack.c.bf16 (!%p1088_p3), %v390_v1, %v388_v0  ;;  %v389_v5 = vld [vmem:[%s1778_s1 + $0x10] sm:$0xff] (!%p1088_p3)  ;;  %v392_v6 = vld [vmem:[%s1778_s1 + $0x28] sm:$0xff] (!%p1088_p3)  ;;  %v394_v7 = vld [vmem:[%s1778_s1 + $0x38] sm:$0xff] (!%p1088_p3)  ;;  %495 = vmatprep.mubr.f32.mxu0 (!%p1088_p3), %v1400_v8 }
  0x31   : > { %v1132_v9 = vpack.c.bf16 (!%p1088_p3), %v389_v5, %v387_v2  ;;  %v1134_v10 = vpack.c.bf16 (!%p1088_p3), %v394_v7, %v392_v6  ;;  %v391_v11 = vld [vmem:[%s1778_s1 + $0x20] sm:$0xff] (!%p1088_p3)  ;;  %v393_v12 = vld [vmem:[%s1778_s1 + $0x30] sm:$0xff] (!%p1088_p3)  ;;  %v396_v13 = vld [vmem:[%s1778_s1 + $0x48] sm:$0xff] (!%p1088_p3)  ;;  %vm1544_vm0 = vcmp.lt.s32.totalorder (!%p1088_p3), %v380_v3, 256 }
  0x32   : > { %1131 = vmatprep.subr.bf16.mxu0 (!%p1088_p3), %v1130_v4  ;;  %v398_v15 = vld [vmem:[%s1778_s1 + $0x58] sm:$0xff] (!%p1088_p3)  ;;  %384 = vst.msk [vmem:[#allocation2] sm:$0x3] (!%p1088_p3), %vm1544_vm0, %v1400_v8  ;;  %385 = vst.msk [vmem:[#allocation3] sm:$0x3] (!%p1088_p3), %vm1544_vm0, %v1400_v8  ;;  %v1136_v16 = vpack.c.bf16 (!%p1088_p3), %v393_v12, %v391_v11  ;;  %v395_v18 = vld [vmem:[%s1778_s1 + $0x40] sm:$0xff] (!%p1088_p3) }
  0x33   : > { %1133 = vmatpush1.bf16.msra.mxu0 (!%p1088_p3), %v1132_v9  ;;  %v1138_v17 = vpack.c.bf16 (!%p1088_p3), %v398_v15, %v396_v13  ;;  %v397_v19 = vld [vmem:[%s1778_s1 + $0x50] sm:$0xff] (!%p1088_p3)  ;;  %v400_v20 = vld [vmem:[%s1778_s1 + $0x68] sm:$0xff] (!%p1088_p3)  ;;  %v402_v21 = vld [vmem:[%s1778_s1 + $0x78] sm:$0xff] (!%p1088_p3) }
  0x34   : > { %1135 = vmatprep.subr.bf16.mxu0 (!%p1088_p3), %v1134_v10  ;;  %v1140_v22 = vpack.c.bf16 (!%p1088_p3), %v397_v19, %v395_v18  ;;  %v1142_v23 = vpack.c.bf16 (!%p1088_p3), %v402_v21, %v400_v20  ;;  %v399_v24 = vld [vmem:[%s1778_s1 + $0x60] sm:$0xff] (!%p1088_p3)  ;;  %v401_v25 = vld [vmem:[%s1778_s1 + $0x70] sm:$0xff] (!%p1088_p3)  ;;  %v404_v26 = vld [vmem:[%s1778_s1 + $0x88] sm:$0xff] (!%p1088_p3) }
  0x35   : > { %v406_v27 = vld [vmem:[%s1778_s1 + $0x98] sm:$0xff] (!%p1088_p3)  ;;  %v403_v28 = vld [vmem:[%s1778_s1 + $0x80] sm:$0xff] (!%p1088_p3)  ;;  %v405_v29 = vld [vmem:[%s1778_s1 + $0x90] sm:$0xff] (!%p1088_p3)  ;;  %v1144_v33 = vpack.c.bf16 (!%p1088_p3), %v401_v25, %v399_v24 }
  0x36   : > { %v505_v30 = vld [vmem:[#allocation5 + $0x8] sm:$0xff] (!%p1088_p3)  ;;  %v507_v31 = vld [vmem:[#allocation5 + $0x18] sm:$0xff] (!%p1088_p3)  ;;  %v504_v32 = vld [vmem:[#allocation5] sm:$0xff] (!%p1088_p3)  ;;  %v1146_v38 = vpack.c.bf16 (!%p1088_p3), %v406_v27, %v404_v26  ;;  %v1148_v48 = vpack.c.bf16 (!%p1088_p3), %v405_v29, %v403_v28 }
  0x37   : > { %1137 = vmatpush1.bf16.msra.mxu0 %v1136_v16  ;;  %v1162_v34 = vpack.c.bf16 %v507_v31, %v505_v30  ;;  %v506_v35 = vld [vmem:[#allocation5 + $0x10] sm:$0xff]  ;;  %v509_v36 = vld [vmem:[#allocation5 + $0x28] sm:$0xff]  ;;  %v511_v37 = vld [vmem:[#allocation5 + $0x38] sm:$0xff] }
  0x38   : > { %1139 = vmatprep.subr.bf16.mxu0 %v1138_v17  ;;  %v1164_v39 = vpack.c.bf16 %v506_v35, %v504_v32  ;;  %v1166_v40 = vpack.c.bf16 %v511_v37, %v509_v36  ;;  %v508_v41 = vld [vmem:[#allocation5 + $0x20] sm:$0xff]  ;;  %v510_v42 = vld [vmem:[#allocation5 + $0x30] sm:$0xff]  ;;  %v513_v43 = vld [vmem:[#allocation5 + $0x48] sm:$0xff] }
  0x39   : > { %v408_v44 = vld [vmem:[%s1778_s1 + $0xa8] sm:$0xff]  ;;  %v410_v45 = vld [vmem:[%s1778_s1 + $0xb8] sm:$0xff]  ;;  %1163 = vmatprep.subr.bf16.mxu1 %v1162_v34  ;;  %v1168_v47 = vpack.c.bf16 %v510_v42, %v508_v41  ;;  %v407_v49 = vld [vmem:[%s1778_s1 + $0xa0] sm:$0xff] }
  0x3a   : > { %v515_v46 = vld [vmem:[#allocation5 + $0x58] sm:$0xff]  ;;  %1165 = vmatpush1.bf16.msra.mxu1 %v1164_v39  ;;  %v512_v51 = vld [vmem:[#allocation5 + $0x40] sm:$0xff]  ;;  %v514_v52 = vld [vmem:[#allocation5 + $0x50] sm:$0xff]  ;;  %v1150_v53 = vpack.c.bf16 %v410_v45, %v408_v44 }
  0x3b   : > { %1141 = vmatpush1.bf16.msra.mxu0 %v1140_v22  ;;  %1167 = vmatprep.subr.bf16.mxu1 %v1166_v40  ;;  %v1170_v50 = vpack.c.bf16 %v515_v46, %v513_v43  ;;  %v409_v54 = vld [vmem:[%s1778_s1 + $0xb0] sm:$0xff]  ;;  %v517_v55 = vld [vmem:[#allocation5 + $0x68] sm:$0xff]  ;;  %v412_v57 = vld [vmem:[%s1778_s1 + $0xc8] sm:$0xff]  ;;  %v1172_v59 = vpack.c.bf16 %v514_v52, %v512_v51 }
  0x3c   : > { %1143 = vmatprep.subr.bf16.mxu0 %v1142_v23  ;;  %v519_v56 = vld [vmem:[#allocation5 + $0x78] sm:$0xff]  ;;  %v414_v58 = vld [vmem:[%s1778_s1 + $0xd8] sm:$0xff]  ;;  %v1152_v60 = vpack.c.bf16 %v409_v54, %v407_v49  ;;  %v411_v61 = vld [vmem:[%s1778_s1 + $0xc0] sm:$0xff] }
  0x3d   : > { %v1174_v62 = vpack.c.bf16 %v519_v56, %v517_v55  ;;  %v516_v63 = vld [vmem:[#allocation5 + $0x60] sm:$0xff]  ;;  %v518_v0 = vld [vmem:[#allocation5 + $0x70] sm:$0xff]  ;;  %v1154_v1 = vpack.c.bf16 %v414_v58, %v412_v57  ;;  %v521_v4 = vld [vmem:[#allocation5 + $0x88] sm:$0xff] }
  0x3e   : > { %1169 = vmatpush1.bf16.msra.mxu1 %v1168_v47  ;;  %v413_v2 = vld [vmem:[%s1778_s1 + $0xd0] sm:$0xff]  ;;  %v416_v6 = vld [vmem:[%s1778_s1 + $0xe8] sm:$0xff]  ;;  %v418_v7 = vld [vmem:[%s1778_s1 + $0xf8] sm:$0xff]  ;;  %v1176_v8 = vpack.c.bf16 %v518_v0, %v516_v63 }
  0x3f   : > { %1145 = vmatpush1.bf16.msra.mxu0 %v1144_v33  ;;  %1171 = vmatprep.subr.bf16.mxu1 %v1170_v50  ;;  %v523_v5 = vld [vmem:[#allocation5 + $0x98] sm:$0xff]  ;;  %v1156_v9 = vpack.c.bf16 %v413_v2, %v411_v61  ;;  %v415_v10 = vld [vmem:[%s1778_s1 + $0xe0] sm:$0xff]  ;;  %v520_v12 = vld [vmem:[#allocation5 + $0x80] sm:$0xff]  ;;  %v1158_v15 = vpack.c.bf16 %v418_v7, %v416_v6 }
  0x40   : > { %1147 = vmatprep.subr.bf16.mxu0 %v1146_v38  ;;  %v1178_v11 = vpack.c.bf16 %v523_v5, %v521_v4  ;;  %v522_v13 = vld [vmem:[#allocation5 + $0x90] sm:$0xff]  ;;  %v417_v16 = vld [vmem:[%s1778_s1 + $0xf0] sm:$0xff]  ;;  %v525_v17 = vld [vmem:[#allocation5 + $0xa8] sm:$0xff] }
  0x41   : > { %v527_v18 = vld [vmem:[#allocation5 + $0xb8] sm:$0xff]  ;;  %v1180_v19 = vpack.c.bf16 %v522_v13, %v520_v12  ;;  %v1160_v20 = vpack.c.bf16 %v417_v16, %v415_v10  ;;  %v524_v22 = vld [vmem:[#allocation5 + $0xa0] sm:$0xff]  ;;  %v526_v23 = vld [vmem:[#allocation5 + $0xb0] sm:$0xff] }
  0x42   : > { %1173 = vmatpush1.bf16.msra.mxu1 %v1172_v59  ;;  %v1182_v21 = vpack.c.bf16 %v527_v18, %v525_v17  ;;  %v529_v24 = vld [vmem:[#allocation5 + $0xc8] sm:$0xff]  ;;  %v531_v25 = vld [vmem:[#allocation5 + $0xd8] sm:$0xff]  ;;  %v1184_v26 = vpack.c.bf16 %v526_v23, %v524_v22  ;;  %v528_v29 = vld [vmem:[#allocation5 + $0xc0] sm:$0xff] }
  0x43   : > { %1149 = vmatpush1.bf16.msra.mxu0 %v1148_v48  ;;  %1175 = vmatprep.subr.bf16.mxu1 %v1174_v62  ;;  %v386_v27 = vld [vmem:[%s1777_s0] sm:$0xff]  ;;  %v1186_v28 = vpack.c.bf16 %v531_v25, %v529_v24  ;;  %v535_v32 = vld [vmem:[#allocation5 + $0xf8] sm:$0xff]  ;;  %v532_v35 = vld [vmem:[#allocation5 + $0xe0] sm:$0xff]  ;;  %v422_v24 = vshrl.u32 %v380_v3, 7 }
  0x44   : > { %1151 = vmatprep.subr.bf16.mxu0 %v1150_v53  ;;  %v530_v30 = vld [vmem:[#allocation5 + $0xd0] sm:$0xff]  ;;  %v533_v31 = vld [vmem:[#allocation5 + $0xe8] sm:$0xff]  ;;  %v539_v38 = vld [vmem:[#allocation5 + $0x118] sm:$0xff] }
  0x45   : > { %v1188_v33 = vpack.c.bf16 %v530_v30, %v528_v29  ;;  %v1190_v34 = vpack.c.bf16 %v535_v32, %v533_v31  ;;  %v534_v36 = vld [vmem:[#allocation5 + $0xf0] sm:$0xff]  ;;  %v537_v37 = vld [vmem:[#allocation5 + $0x108] sm:$0xff]  ;;  %v536_v41 = vld [vmem:[#allocation5 + $0x100] sm:$0xff]  ;;  %v423_v25 = vsub.s32 0, %v422_v24 }
  0x46   : > { %1177 = vmatpush1.bf16.msra.mxu1 %v1176_v8  ;;  %v1192_v39 = vpack.c.bf16 %v534_v36, %v532_v35  ;;  %v1194_v40 = vpack.c.bf16 %v539_v38, %v537_v37  ;;  %v538_v42 = vld [vmem:[#allocation5 + $0x110] sm:$0xff]  ;;  %v541_v43 = vld [vmem:[#allocation5 + $0x128] sm:$0xff]  ;;  %v543_v44 = vld [vmem:[#allocation5 + $0x138] sm:$0xff] }
  0x47   : > { %1153 = vmatpush1.bf16.msra.mxu0 %v1152_v60  ;;  %1179 = vmatprep.subr.bf16.mxu1 %v1178_v11  ;;  %v1196_v45 = vpack.c.bf16 %v538_v42, %v536_v41  ;;  %v1198_v46 = vpack.c.bf16 %v543_v44, %v541_v43  ;;  %v540_v47 = vld [vmem:[#allocation5 + $0x120] sm:$0xff]  ;;  %v542_v48 = vld [vmem:[#allocation5 + $0x130] sm:$0xff]  ;;  %v545_v49 = vld [vmem:[#allocation5 + $0x148] sm:$0xff] }
  0x48   : > { %1155 = vmatprep.subr.bf16.mxu0 %v1154_v1  ;;  %v547_v50 = vld [vmem:[#allocation5 + $0x158] sm:$0xff]  ;;  %v1200_v51 = vpack.c.bf16 %v542_v48, %v540_v47  ;;  %v544_v53 = vld [vmem:[#allocation5 + $0x140] sm:$0xff]  ;;  %v546_v54 = vld [vmem:[#allocation5 + $0x150] sm:$0xff]  ;;  %v1401_v48 = vmov 1966171168  }
  0x49   : > { %v1202_v52 = vpack.c.bf16 %v547_v50, %v545_v49  ;;  %v549_v55 = vld [vmem:[#allocation5 + $0x168] sm:$0xff]  ;;  %v551_v56 = vld [vmem:[#allocation5 + $0x178] sm:$0xff]  ;;  %v1204_v57 = vpack.c.bf16 %v546_v54, %v544_v53  ;;  %v548_v59 = vld [vmem:[#allocation5 + $0x160] sm:$0xff]  ;;  %v762_v49 = vunpack.c.l.s4 %v1401_v48 }
  0x4a   : > { %1181 = vmatpush1.bf16.msra.mxu1 %v1180_v19  ;;  %v1206_v58 = vpack.c.bf16 %v551_v56, %v549_v55  ;;  %v550_v60 = vld [vmem:[#allocation5 + $0x170] sm:$0xff]  ;;  %v553_v61 = vld [vmem:[#allocation5 + $0x188] sm:$0xff]  ;;  %v555_v62 = vld [vmem:[#allocation5 + $0x198] sm:$0xff] }
  0x4b   : > { %1157 = vmatpush1.bf16.msra.mxu0 %v1156_v9  ;;  %1183 = vmatprep.subr.bf16.mxu1 %v1182_v21  ;;  %v1208_v63 = vpack.c.bf16 %v550_v60, %v548_v59  ;;  %v1210_v0 = vpack.c.bf16 %v555_v62, %v553_v61  ;;  %v552_v1 = vld [vmem:[#allocation5 + $0x180] sm:$0xff]  ;;  %v554_v2 = vld [vmem:[#allocation5 + $0x190] sm:$0xff]  ;;  %v557_v4 = vld [vmem:[#allocation5 + $0x1a8] sm:$0xff] }
  0x4c   : > { %1159 = vmatprep.subr.bf16.mxu0 %v1158_v15  ;;  %v559_v5 = vld [vmem:[#allocation5 + $0x1b8] sm:$0xff]  ;;  %v1212_v6 = vpack.c.bf16 %v554_v2, %v552_v1  ;;  %v556_v8 = vld [vmem:[#allocation5 + $0x1a0] sm:$0xff]  ;;  %v558_v9 = vld [vmem:[#allocation5 + $0x1b0] sm:$0xff] }
  0x4d   : > { %v1214_v7 = vpack.c.bf16 %v559_v5, %v557_v4  ;;  %v561_v10 = vld [vmem:[#allocation5 + $0x1c8] sm:$0xff]  ;;  %v563_v11 = vld [vmem:[#allocation5 + $0x1d8] sm:$0xff]  ;;  %v1216_v12 = vpack.c.bf16 %v558_v9, %v556_v8  ;;  %v560_v15 = vld [vmem:[#allocation5 + $0x1c0] sm:$0xff] }
  0x4e   : > { %1185 = vmatpush1.bf16.msra.mxu1 %v1184_v26  ;;  %v1218_v13 = vpack.c.bf16 %v563_v11, %v561_v10  ;;  %v562_v16 = vld [vmem:[#allocation5 + $0x1d0] sm:$0xff]  ;;  %v565_v18 = vld [vmem:[#allocation5 + $0x1e8] sm:$0xff]  ;;  %v567_v19 = vld [vmem:[#allocation5 + $0x1f8] sm:$0xff] }
  0x4f   : > { %1161 = vmatpush1.bf16.msra.mxu0 %v1160_v20  ;;  %1187 = vmatprep.subr.bf16.mxu1 %v1186_v28  ;;  %v1220_v17 = vpack.c.bf16 %v562_v16, %v560_v15  ;;  %v1222_v20 = vpack.c.bf16 %v567_v19, %v565_v18  ;;  %v564_v21 = vld [vmem:[#allocation5 + $0x1e0] sm:$0xff]  ;;  %v566_v22 = vld [vmem:[#allocation5 + $0x1f0] sm:$0xff]  ;;  %v419_v26 = vld [vmem:[%s1779_s2] sm:$0x3] }
  0x50   : > { %v1224_v23 = vpack.c.bf16 %v566_v22, %v564_v21  ;;  %v424_v28 = vrot.slane %v419_v26, %v423_v25  ;;  %v568_v3 = vld [vmem:[%s1781_s4] sm:$0x3]  ;;  %v782_v16 = vld [vmem:[#allocation3] sm:$0x3] }
  0x51   : > { %v573_v36 = vrot.slane %v568_v3, %v423_v25 }
  0x52   : > { %496 = vmatmul.mubr.f32.vlgmr.msra.gmra.mrb[0].mxu0 %v386_v27  ;;  %1189 = vmatpush1.bf16.msra.mxu1 %v1188_v33  ;;  %v427_v27 = vsub.s32 1, %v422_v24 }
  0x53   : > { %1191 = vmatprep.subr.bf16.mxu1 %v1190_v34 }
  0x54   : > { %v428_v29 = vrot.slane %v419_v26, %v427_v27  ;;  %v577_v37 = vrot.slane %v568_v3, %v427_v27 }
  0x56   : > { %1193 = vmatpush1.bf16.msra.mxu1 %v1192_v39 }
  0x57   : > { %1195 = vmatprep.subr.bf16.mxu1 %v1194_v40 }
  0x5a   : > { %1197 = vmatpush1.bf16.msra.mxu1 %v1196_v45 }
  0x5b   : > { %1199 = vmatprep.subr.bf16.mxu1 %v1198_v46 }
  0x5e   : > { %1201 = vmatpush1.bf16.msra.mxu1 %v1200_v51 }
  0x5f   : > { %1203 = vmatprep.subr.bf16.mxu1 %v1202_v52 }
  0x62   : > { %1205 = vmatpush1.bf16.msra.mxu1 %v1204_v57 }
  0x63   : > { %1207 = vmatprep.subr.bf16.mxu1 %v1206_v58  ;;  %v763_v58 = vunpack.c.0.s8 %v762_v49 }
  0x65   : > { %v766_v4 = vsub.s32 %v763_v58, %v422_v24 }
  0x66   : > { %1209 = vmatpush1.bf16.msra.mxu1 %v1208_v63 }
  0x67   : > { %1211 = vmatprep.subr.bf16.mxu1 %v1210_v0 }
  0x6a   : > { %1213 = vmatpush1.bf16.msra.mxu1 %v1212_v6 }
  0x6b   : > { %1215 = vmatprep.subr.bf16.mxu1 %v1214_v7 }
  0x6e   : > { %1217 = vmatpush1.bf16.msra.mxu1 %v1216_v12  ;;  %v745_v12 = vld [vmem:[#allocation2] sm:$0x3] }
  0x6f   : > { %1219 = vmatprep.subr.bf16.mxu1 %v1218_v13 }
  0x72   : > { %1221 = vmatpush1.bf16.msra.mxu1 %v1220_v17 }
  0x73   : > { %1223 = vmatprep.subr.bf16.mxu1 %v1222_v20 }
  0x76   : > { %1225 = vmatpush1.bf16.msra.mxu1 %v1224_v23 }
 0x125   : > { %v497_v30 = vpop.f32.mrb[0].mxu0 }
 0x126   : > { %v498_v31 = vadd.f32 %v497_v30, %v424_v28  ;;  %v499_v32 = vpop.f32.mrb[1].mxu0 }
 0x127   : > { %v500_v33 = vadd.f32 %v499_v32, %v428_v29 }
 0x128   : > { %v502_v35 = vmax.f32 %v498_v31, 0.0 }
 0x129   : > { %v503_v34 = vmax.f32 %v500_v33, 0.0 }
 0x12b   : > { %644 = vmatprep.mubr.f32.mxu1 %v503_v34 }
 0x12c   : > { %645 = vmatmul.mubr.f32.vlgmr.msra.gmra.mrb[0].mxu1 %v502_v35 }
 0x1ff   : > { %v646_v38 = vpop.f32.mrb[0].mxu1 }
 0x200   : > { %v647_v39 = vadd.f32 %v646_v38, %v573_v36  ;;  %v648_v40 = vpop.f32.mrb[1].mxu1 }
 0x201   : > { %v649_v41 = vadd.f32 %v648_v40, %v577_v37 }
 0x202   : > { %657 = vst [vmem:[#allocation4] sm:$0xff] %v647_v39  ;;  %v746_v42 = vrot.slane %v647_v39, 4  ;;  %v783_v43 = vmul.f32 %v647_v39, %v647_v39 }
 0x203   : > { %658 = vst [vmem:[#allocation4 + $0x8] sm:$0xff] %v649_v41  ;;  %v752_v44 = vrot.slane %v649_v41, 4  ;;  %v784_v45 = vmul.f32 %v649_v41, %v649_v41 }
 0x204   : > { %v747_v46 = vadd.f32 %v746_v42, %v647_v39  ;;  %v785_v47 = vrot.slane %v783_v43, 4 }
 0x205   : > { %v753_v50 = vadd.f32 %v752_v44, %v649_v41  ;;  %v791_v51 = vrot.slane %v784_v45, 4 }
 0x206   : > { %v748_v52 = vrot.slane %v747_v46, 2  ;;  %v786_v53 = vadd.f32 %v785_v47, %v783_v43 }
 0x207   : > { %v754_v54 = vrot.slane %v753_v50, 2  ;;  %v792_v55 = vadd.f32 %v791_v51, %v784_v45 }
 0x208   : > { %v749_v56 = vadd.f32 %v748_v52, %v747_v46  ;;  %v787_v57 = vrot.slane %v786_v53, 2 }
 0x209   : > { %v755_v59 = vadd.f32 %v754_v54, %v753_v50  ;;  %v793_v60 = vrot.slane %v792_v55, 2 }
 0x20a   : > { %v750_v61 = vrot.slane %v749_v56, 1  ;;  %v788_v62 = vadd.f32 %v787_v57, %v786_v53 }
 0x20b   : > { %v756_v63 = vrot.slane %v755_v59, 1  ;;  %v794_v0 = vadd.f32 %v793_v60, %v792_v55 }
 0x20c   : > { %v751_v1 = vadd.f32 %v750_v61, %v749_v56  ;;  %v789_v2 = vrot.slane %v788_v62, 1 }
 0x20d   : > { %v757_v5 = vadd.f32 %v756_v63, %v755_v59  ;;  %v795_v6 = vrot.slane %v794_v0, 1 }
 0x20e   : > { %v790_v7 = vadd.f32 %v789_v2, %v788_v62 }
 0x20f   : > { %v760_v8 = vcombine.low %v751_v1, %v757_v5  ;;  %v796_v9 = vadd.f32 %v795_v6, %v794_v0 }
 0x211   : > { %v767_v10 = vrot.slane %v760_v8, %v766_v4  ;;  %v799_v11 = vcombine.low %v790_v7, %v796_v9 }
 0x213   : > { %v774_v13 = vrot.slane %v767_v10, %v766_v4  ;;  %v806_v15 = vrot.slane %v799_v11, %v766_v4 }
 0x215   : > { %v776_v17 = vadd.f32 %v774_v13, %v745_v12  ;;  %v813_v18 = vrot.slane %v806_v15, %v766_v4 }
 0x217   : > { %781 = vst.msk [vmem:[#allocation2] sm:$0x3] %vm1544_vm0, %v776_v17  ;;  %v815_v19 = vadd.f32 %v813_v18, %v782_v16 }
 0x219   : > { %816 = vst.msk [vmem:[#allocation3] sm:$0x3] %vm1544_vm0, %v815_v19 }
 0x21a PF: > { %p1089_p4 = scmp.ne.s32.totalorder %s1387_s30, 1 }
 0x21b   : > { %v887_v20 = vld [vmem:[%s1784_s7 + $0x80] sm:$0xff] (!%p1089_p4)  ;;  %v888_v21 = vld [vmem:[%s1784_s7 + $0x88] sm:$0xff] (!%p1089_p4)  ;;  %v889_v24 = vld [vmem:[%s1784_s7 + $0x90] sm:$0xff] (!%p1089_p4)  ;;  %v844_v6 = vlaneseq (!%p1089_p4)  ;;  %vm980_vm1 = vcmask (!%p1089_p4), 80896  }
 0x21c   : > { %820 = sbr.rel (%p1089_p4) target bundleno = 798 (0x31e), region = 80  ;;  %v871_v22 = vld [vmem:[%s1784_s7] sm:$0xff] (!%p1089_p4)  ;;  %v1226_v23 = vpack.c.bf16 (!%p1089_p4), %v888_v21, %v887_v20  ;;  %v872_v14 = vld [vmem:[%s1784_s7 + $0x8] sm:$0xff] (!%p1089_p4)  ;;  %v890_v25 = vld [vmem:[%s1784_s7 + $0x98] sm:$0xff] (!%p1089_p4) }
 0x21d   : > { %v1228_v26 = vpack.c.bf16 (!%p1089_p4), %v872_v14, %v871_v22  ;;  %v1230_v27 = vpack.c.bf16 (!%p1089_p4), %v890_v25, %v889_v24  ;;  %v873_v28 = vld [vmem:[%s1784_s7 + $0x10] sm:$0xff] (!%p1089_p4)  ;;  %v874_v29 = vld [vmem:[%s1784_s7 + $0x18] sm:$0xff] (!%p1089_p4)  ;;  %v891_v30 = vld [vmem:[%s1784_s7 + $0xa0] sm:$0xff] (!%p1089_p4)  ;;  %v845_v11 = vshrl.u32 (!%p1089_p4), %v844_v6, 7 }
 0x21e   : > { %1227 = vmatprep.subr.bf16.mxu0 (!%p1089_p4), %v1226_v23  ;;  %v892_v31 = vld [vmem:[%s1784_s7 + $0xa8] sm:$0xff] (!%p1089_p4)  ;;  %v1232_v32 = vpack.c.bf16 (!%p1089_p4), %v874_v29, %v873_v28  ;;  %v875_v34 = vld [vmem:[%s1784_s7 + $0x20] sm:$0xff] (!%p1089_p4)  ;;  %v893_v3 = vld [vmem:[%s1784_s7 + $0xb0] sm:$0xff] (!%p1089_p4) }
 0x21f   : > { %1229 = vmatpush3.bf16.msra.mxu0 (!%p1089_p4), %v1228_v26  ;;  %v1234_v33 = vpack.c.bf16 (!%p1089_p4), %v892_v31, %v891_v30  ;;  %v876_v35 = vld [vmem:[%s1784_s7 + $0x28] sm:$0xff] (!%p1089_p4)  ;;  %v894_v36 = vld [vmem:[%s1784_s7 + $0xb8] sm:$0xff] (!%p1089_p4)  ;;  %v877_v39 = vld [vmem:[%s1784_s7 + $0x30] sm:$0xff] (!%p1089_p4)  ;;  %v850_v15 = vsub.s32 (!%p1089_p4), 1, %v845_v11  ;;  %v846_v16 = vsub.s32 (!%p1089_p4), 0, %v845_v11 }
 0x220   : > { %1231 = vmatprep.subr.bf16.mxu0 (!%p1089_p4), %v1230_v27  ;;  %v1236_v37 = vpack.c.bf16 (!%p1089_p4), %v876_v35, %v875_v34  ;;  %v1238_v38 = vpack.c.bf16 (!%p1089_p4), %v894_v36, %v893_v3  ;;  %v878_v40 = vld [vmem:[%s1784_s7 + $0x38] sm:$0xff] (!%p1089_p4)  ;;  %v895_v41 = vld [vmem:[%s1784_s7 + $0xc0] sm:$0xff] (!%p1089_p4)  ;;  %v896_v42 = vld [vmem:[%s1784_s7 + $0xc8] sm:$0xff] (!%p1089_p4) }
 0x221   : > { %v821_v43 = vld [vmem:[#allocation2] sm:$0x3] (!%p1089_p4)  ;;  %v823_v45 = vld [vmem:[#allocation3] sm:$0x3] (!%p1089_p4)  ;;  %v1240_v46 = vpack.c.bf16 (!%p1089_p4), %v878_v40, %v877_v39  ;;  %v1242_v48 = vpack.c.bf16 (!%p1089_p4), %v896_v42, %v895_v41  ;;  %v880_v50 = vld [vmem:[%s1784_s7 + $0x48] sm:$0xff] (!%p1089_p4) }
 0x222   : > { %v822_v44 = vmul.f32 (!%p1089_p4), 0.125, %v821_v43  ;;  %v824_v47 = vmul.f32 (!%p1089_p4), 0.125, %v823_v45  ;;  %v879_v49 = vld [vmem:[%s1784_s7 + $0x40] sm:$0xff] (!%p1089_p4)  ;;  %v897_v52 = vld [vmem:[%s1784_s7 + $0xd0] sm:$0xff] (!%p1089_p4)  ;;  %v898_v53 = vld [vmem:[%s1784_s7 + $0xd8] sm:$0xff] (!%p1089_p4) }
 0x223   : > { %1233 = vmatpush3.bf16.msra.mxu0 %v1232_v32  ;;  %v1244_v55 = vpack.c.bf16 %v880_v50, %v879_v49  ;;  %v1246_v56 = vpack.c.bf16 %v898_v53, %v897_v52  ;;  %v881_v57 = vld [vmem:[%s1784_s7 + $0x50] sm:$0xff]  ;;  %v882_v58 = vld [vmem:[%s1784_s7 + $0x58] sm:$0xff]  ;;  %v899_v60 = vld [vmem:[%s1784_s7 + $0xe0] sm:$0xff] }
 0x224   : > { %1235 = vmatprep.subr.bf16.mxu0 %v1234_v33  ;;  %v825_v51 = vmul.f32 %v822_v44, %v822_v44  ;;  %v900_v61 = vld [vmem:[%s1784_s7 + $0xe8] sm:$0xff]  ;;  %v1248_v63 = vpack.c.bf16 %v882_v58, %v881_v57  ;;  %v883_v1 = vld [vmem:[%s1784_s7 + $0x60] sm:$0xff]  ;;  %v901_v4 = vld [vmem:[%s1784_s7 + $0xf0] sm:$0xff] }
 0x225   : > { %v1250_v0 = vpack.c.bf16 %v900_v61, %v899_v60  ;;  %v884_v2 = vld [vmem:[%s1784_s7 + $0x68] sm:$0xff]  ;;  %v902_v5 = vld [vmem:[%s1784_s7 + $0xf8] sm:$0xff]  ;;  %v885_v9 = vld [vmem:[%s1784_s7 + $0x70] sm:$0xff] }
 0x226   : > { %v826_v54 = vsub.f32 %v824_v47, %v825_v51  ;;  %v1252_v7 = vpack.c.bf16 %v884_v2, %v883_v1  ;;  %v1254_v8 = vpack.c.bf16 %v902_v5, %v901_v4  ;;  %v886_v10 = vld [vmem:[%s1784_s7 + $0x78] sm:$0xff]  ;;  %v828_v13 = vld [vmem:[%s1782_s5] sm:$0x3]  ;;  %v842_v20 = vld [vmem:[#allocation4 + $0x8] sm:$0xff] }
 0x227   : > { %1237 = vmatpush3.bf16.msra.mxu0 %v1236_v37  ;;  %v1256_v12 = vpack.c.bf16 %v886_v10, %v885_v9  ;;  %v832_v19 = vld [vmem:[%s1783_s6] sm:$0x3]  ;;  %v841_v21 = vld [vmem:[#allocation4] sm:$0xff] }
 0x228   : > { %1239 = vmatprep.subr.bf16.mxu0 %v1238_v38  ;;  %v827_v59 = vmax.f32 %v826_v54, 0.0  ;;  %v1090_v34 = vld [vmem:[%s1785_s8] ss:$0 sm:$0xff] }
 0x22a   : > { %v829_v62 = vadd.f32 1e-05, %v827_v59 }
 0x22b   : > { %1241 = vmatpush3.bf16.msra.mxu0 %v1240_v46 }
 0x22c   : > { %1243 = vmatprep.subr.bf16.mxu0 %v1242_v48  ;;  %1309 = vrsqrt.f32 %v829_v62 }
 0x22f   : > { %1245 = vmatpush3.bf16.msra.mxu0 %v1244_v55 }
 0x230   : > { %1247 = vmatprep.subr.bf16.mxu0 %v1246_v56 }
 0x233   : > { %1249 = vmatpush3.bf16.msra.mxu0 %v1248_v63 }
 0x234   : > { %1251 = vmatprep.subr.bf16.mxu0 %v1250_v0 }
 0x236   : > { %v1310_v17 = vpop.eup %1309 }
 0x237   : > { %1253 = vmatpush3.bf16.msra.mxu0 %v1252_v7  ;;  %v831_v18 = vmul.f32 %v1310_v17, %v828_v13 }
 0x238   : > { %1255 = vmatprep.subr.bf16.mxu0 %v1254_v8 }
 0x239   : > { %v833_v22 = vmul.f32 %v831_v18, %v822_v44  ;;  %v851_v23 = vrot.slane %v831_v18, %v850_v15  ;;  %v847_v14 = vrot.slane %v831_v18, %v846_v16 }
 0x23b   : > { %1257 = vmatpush3.bf16.msra.mxu0 %v1256_v12  ;;  %v834_v24 = vsub.f32 %v832_v19, %v833_v22  ;;  %v855_v25 = vmul.f32 %v851_v23, %v842_v20  ;;  %v854_v26 = vmul.f32 %v847_v14, %v841_v21 }
 0x23d   : > { %v864_v27 = vrot.slane %v834_v24, %v850_v15  ;;  %v860_v28 = vrot.slane %v834_v24, %v846_v16 }
 0x23f   : > { %v868_v29 = vadd.f32 %v864_v27, %v855_v25  ;;  %v867_v30 = vadd.f32 %v860_v28, %v854_v26 }
 0x241   : > { %v870_v31 = vmax.f32 %v868_v29, 0.0  ;;  %v869_v32 = vmax.f32 %v867_v30, 0.0 }
 0x243   : > { %974 = vmatprep.mubr.f32.mxu0 %v870_v31 }
 0x244   : > { %975 = vmatmul.mubr.f32.vlgmr.msra.gmra.mrb[0].mxu0 %v869_v32 }
 0x317   : > { %v1127_v33 = vpop.f32.mrb[0].mxu0 }
 0x318   : > { %v1128_v35 = vpop.f32.mrb[1].mxu0 }
 0x319   : > { %v1129_v3 = vadd.f32 %v1128_v35, %v1127_v33 }
 0x31b   : > { %v977_v36 = vadd.f32 %v1129_v3, %v1090_v34 }
 0x31d   : > { %981 = vst.msk [vmem:[#allocation8] sm:$0xff] %vm980_vm1, %v977_v36 }
 0x31e PF: > { %p1743_p6 = scmp.eq.s32.totalorder %s1080_s12, 1  ;;  %s1402_s19 = smov [#allocation8]  }
 0x31f   : > { %s997_s23 = sshll.u32 %s1402_s19, 4  ;;  %s998_s23 = int_to_ptr.vmem [resolvable:$true] %s997_s23 }
 0x320   : > { %s1339_s30 = scalar_lea.vmem %s998_s23, 128  ;;  %s1345_s18 = scalar_lea.vmem %s998_s23, 256 }
 0x321   : > { %p1340_p8 = scmp.ne.s32.totalorder %s998_s23, %s1339_s30  ;;  %p1346_p12 = scmp.lt.s32.totalorder %s998_s23, %s998_s23 }
 0x322   : > { %p1347_p13 = scmp.lt.s32.totalorder %s1345_s18, %s1339_s30 }
 0x323   : > { %p1341_p10 = pnand %p1340_p8, %p1743_p6 }
 0x324   : > { %p1348_p0 = por %p1347_p13, %p1346_p12 }
 0x325   : > { %p1342_p11 = pneg %p1341_p10 }
 0x327   : > { %p1349_p1 = pnand %p1348_p0, %p1342_p11 }
 0x329   : > { %1352 = shalt.err (!%p1349_p1)
}
 0x32a   : > { %s1353_s24 = scalar_lea.hbm %s1786_s9, 128 }
 0x32b   : > { %p1354_p2 = scmp.ne.s32.totalorder %s1786_s9, %s1353_s24  ;;  %p1359_p9 = scmp.lt.u32.totalorder %s1353_s24, %s1786_s9 }
 0x32d   : > { %p1355_p5 = pnand %p1354_p2, %p1743_p6 }
 0x32f   : > { %p1356_p7 = pneg %p1355_p5 }
 0x331   : > { %p1361_p3 = pnand %p1359_p9, %p1356_p7 }
 0x333   : > { %1364 = shalt.err (!%p1361_p3)
}
 0x334   : > { %1263 = dma.vmem_to_hbm [thread:$0]  (%p1743_p6), %s998_s23, 128, %s1786_s9, [#allocation7]  }
 0x335 PF: > { %p1277_p4 = scmp.ge.s32.totalorder %s1395_s11, 2  ;;  %p1278_p8 = scmp.eq.s32.totalorder %s1081_s13, 1 }
 0x337   : > { %p1271_p10 = pnand %p1278_p8, %p1277_p4 }
 0x339   : > { %1382 = dma.done.wait (!%p1271_p10), [#allocation7], 128  }
 0x33a   : > { %1384 = vsyncadd (!%p1271_p10), [#allocation7], 4294967168  ;;  %s23_s11 = sadd.s32 1, %s1395_s11   ;;  %s1798_s30 = smov %s1391_s10 }
 0x33b   : > { %p20_p11 = scmp.ge.s32.totalorder %s23_s11, 4   ;;  %s1799_s10 = smov %s1801_s14 }
 0x33d   :  { %22 = sbr.rel (!%p20_p11) target bundleno = 4 (0x4), region = 118 }
 0x344   :  { %1015 = vsyncpa [#allocation6], 1 }
 0x345   :  { %1017 = vsyncpa [#allocation6 + $0x1], 1 }
 0x346   :  { %1018 = vsyncpa [#allocation7], 1 }
 0x347   :  { %1020 = vsyncpa [#allocation7 + $0x1], 1 }

</bundles_post_ra>
